<compile_context>
chip_gen: v7x
topology: tpu7x:2x2x1
jax: 0.10.0
libtpu: 0.0.40
codegen_flags: <defaults>
</compile_context>

<pallas_src>
import functools

import jax
import jax.numpy as jnp
from jax.experimental import pallas as pl
from jax.experimental.pallas import tpu as pltpu

_VMEM_BUDGET = 20 * 1024 * 1024      # per-kernel working-set budget (bytes)
_VMEM_LIMIT = 32 * 1024 * 1024       # scoped VMEM limit handed to Mosaic


def _round_up(n, m):
    return ((n + m - 1) // m) * m


# --------------------------------------------------------------------------
# Shared GEMM kernel:  out = x @ w + b   (used for input & vocab projections)
# --------------------------------------------------------------------------
def _linear_kernel(x_ref, w_ref, b_ref, out_ref):
    out_ref[...] = (
        jnp.dot(x_ref[...], w_ref[...], preferred_element_type=jnp.float32)
        + b_ref[...]
    ).astype(out_ref.dtype)


def _pick_linear_tiles(M, K, N, in_bytes, budget=_VMEM_BUDGET,
                       tm_cap=512, tn_cap=2048):
    """Pick (tm, tn) so double-buffered tiles fit the VMEM budget."""
    tm_cands = []
    if 2 * M * K * in_bytes <= budget // 2:
        tm_cands.append(M)          # whole-M slab -> weight streamed exactly once
    tm_cands += [d for d in range(min(M, tm_cap), 7, -1)
                 if M % d == 0 and d % 8 == 0]
    tm_cands.append(M)              # full-dim fallback (always a legal block)
    tn_cands = [d for d in range(min(N, tn_cap), 127, -1)
                if N % d == 0 and d % 128 == 0]
    tn_cands.append(N)              # full-dim fallback (always a legal block)
    for tm in tm_cands:
        for tn in tn_cands:
            need = 2 * (tm * K + K * tn + tn) * in_bytes + 2 * tm * tn * 4
            if need <= budget:
                return tm, tn
    return tm_cands[-1], tn_cands[-1]


def linear_pallas(x2d, w, b):
    """x2d: [M, K], w: [K, N], b: [1, N] f32  ->  [M, N] f32 (x @ w + b)."""
    M, K = x2d.shape
    K2, N = w.shape
    assert K2 == K and b.shape == (1, N)
    in_bytes = jnp.dtype(x2d.dtype).itemsize
    tm, tn = _pick_linear_tiles(M, K, N, in_bytes)

    grid_spec = pltpu.PrefetchScalarGridSpec(
        num_scalar_prefetch=0,
        # Output/vocab axis OUTER, row axis inner: the (K, tn) weight tile's
        # block index depends only on the outer axis, so it stays VMEM
        # resident across the whole inner row sweep (weight read from HBM
        # exactly once when tm == M).
        grid=(N // tn, M // tm),
        in_specs=[
            pl.BlockSpec((tm, K), lambda j, i: (i, 0)),
            pl.BlockSpec((K, tn), lambda j, i: (0, j)),
            pl.BlockSpec((1, tn), lambda j, i: (0, j)),
        ],
        out_specs=pl.BlockSpec((tm, tn), lambda j, i: (i, j)),
    )
    return pl.pallas_call(
        _linear_kernel,
        out_shape=jax.ShapeDtypeStruct((M, N), jnp.float32),
        grid_spec=grid_spec,
        compiler_params=pltpu.CompilerParams(
            dimension_semantics=("parallel", "parallel"),
            vmem_limit_bytes=_VMEM_LIMIT,
        ),
    )(x2d, w, b)


# --------------------------------------------------------------------------
# Recurrence kernel: time-chunked LSTM; only h_prev @ W_hh^T on serial path
# --------------------------------------------------------------------------
def _lstm_recurrence_kernel(gx_ref, whh_ref, h_out_ref, h_scr, c_scr, *,
                            hidden_size, time_chunk, unroll):
    H = hidden_size

    # h/c scratch carries across the sequential time-chunk grid axis.
    @pl.when(pl.program_id(0) == 0)
    def _():
        h_scr[...] = jnp.zeros_like(h_scr)
        c_scr[...] = jnp.zeros_like(c_scr)

    whh = whh_ref[...]                       # [H, 4H], VMEM-resident (maybe bf16)

    def step(s, carry):
        gx = gx_ref[s]                       # [B, 4H] f32 = x_t @ W_ih^T + b (hoisted)
        h_prev = h_scr[...]                  # [B, H] f32
        c_prev = c_scr[...]                  # [B, H] f32

        gates = gx + jnp.dot(h_prev.astype(whh.dtype), whh,
                             preferred_element_type=jnp.float32)

        # PyTorch gate order (i, f, g, o); all elementwise math stays f32.
        i_g = jax.nn.sigmoid(gates[:, 0 * H:1 * H])
        f_g = jax.nn.sigmoid(gates[:, 1 * H:2 * H])
        g_g = jnp.tanh(gates[:, 2 * H:3 * H])
        o_g = jax.nn.sigmoid(gates[:, 3 * H:4 * H])

        c_new = f_g * c_prev + i_g * g_g
        h_new = o_g * jnp.tanh(c_new)

        c_scr[...] = c_new
        h_scr[...] = h_new
        h_out_ref[s] = h_new.astype(h_out_ref.dtype)
        return carry

    # Short fixed trip count -> partially unrolled so the LLO scheduler can
    # overlap MXU / EUP / VPU work across consecutive steps without spilling.
    jax.lax.fori_loop(0, time_chunk, step, 0, unroll=unroll)


def _pick_time_chunk(T, B, H, whh_bytes, budget=_VMEM_BUDGET, max_chunk=32):
    """Largest divisor of T (<= max_chunk) whose working set fits the budget."""
    best = 1
    fixed = 2 * H * 4 * H * whh_bytes + 2 * B * H * 4   # W_hh bufs + h/c scratch
    for cand in range(1, min(T, max_chunk) + 1):
        if T % cand:
            continue
        need = fixed + 2 * cand * B * 4 * H * 4 + 2 * cand * B * H * 4
        if need <= budget:
            best = cand
    return best


def decoder_lstm_hidden_pallas(gates_x_tb4h, w_hh_t):
    """gates_x_tb4h: [T, B, 4H] f32 (precomputed x@W_ih^T + bias).
    w_hh_t: [H, 4H].  Returns hidden states [T, B, H] f32."""
    T, B, H4 = gates_x_tb4h.shape
    H = H4 // 4
    assert H4 == 4 * H and w_hh_t.shape == (H, H4)

    whh_bytes = jnp.dtype(w_hh_t.dtype).itemsize
    TC = _pick_time_chunk(T, B, H, whh_bytes)
    # Unroll only a small factor (<=8) so large B*4H live ranges don't spill.
    unroll = TC if TC <= 8 else max(u for u in (8, 4, 2, 1) if TC % u == 0)

    kernel = functools.partial(_lstm_recurrence_kernel, hidden_size=H,
                               time_chunk=TC, unroll=unroll)

    grid_spec = pltpu.PrefetchScalarGridSpec(
        num_scalar_prefetch=0,
        grid=(T // TC,),
        in_specs=[
            pl.BlockSpec((TC, B, H4), lambda c: (c, 0, 0)),   # hoisted input gates
            pl.BlockSpec((H, H4), lambda c: (0, 0)),          # W_hh^T (resident)
        ],
        out_specs=pl.BlockSpec((TC, B, H), lambda c: (c, 0, 0)),
        scratch_shapes=[
            pltpu.VMEM((B, H), jnp.float32),   # h carry
            pltpu.VMEM((B, H), jnp.float32),   # c carry
        ],
    )
    # TODO(synk): on v7x, add a leading batch-split grid axis marked "parallel"
    #             (block B//2) so both TensorCores share the recurrence.
    return pl.pallas_call(
        kernel,
        out_shape=jax.ShapeDtypeStruct((T, B, H), jnp.float32),
        grid_spec=grid_spec,
        compiler_params=pltpu.CompilerParams(
            dimension_semantics=("arbitrary",),   # sequential time recurrence
            vmem_limit_bytes=_VMEM_LIMIT,
        ),
    )(gates_x_tb4h, w_hh_t)


# --------------------------------------------------------------------------
# Full forward (replicates DecoderRNN.forward)
# --------------------------------------------------------------------------
def decoder_rnn_forward(params, features, captions, matmul_dtype=jnp.bfloat16):
    """features: [B, E] f32, captions: [B, Tc] int32 -> logits [B, Tc, V] f32."""
    embed_w = params["embed_w"]                                        # [V, E]
    # Embedding gather + feature concat kept as JAX glue.
    # TODO(synk): could become a scalar-prefetch DMA-gather kernel if the
    #             embedding table ever dominates.
    embeddings = jnp.take(embed_w, captions[:, :-1], axis=0)           # [B, T-1, E]
    inputs = jnp.concatenate([features[:, None, :], embeddings], axis=1)
    inputs = inputs.astype(jnp.float32)                                # [B, T, E]
    B, T, E = inputs.shape
    H = params["w_hh_t"].shape[0]
    V = params["w_lin_t"].shape[1]

    # Pad batch to a sublane multiple and vocab to a lane multiple so every
    # tile is (8,128)-friendly and the vocab tiler always has a 128-aligned
    # divisor (no full-V fallback hazard).
    Bp = _round_up(B, 8)
    Vp = _round_up(V, 128)
    if Bp != B:
        inputs = jnp.pad(inputs, ((0, Bp - B), (0, 0), (0, 0)))

    # Cast MXU operands (activations + weights) to the matmul dtype; biases,
    # accumulation, gate math and outputs stay f32.
    w_ih = params["w_ih_t"].astype(matmul_dtype)                       # [E, 4H]
    w_hh = params["w_hh_t"].astype(matmul_dtype)                       # [H, 4H]
    w_lin = params["w_lin_t"].astype(matmul_dtype)                     # [H, V]
    b_lin = params["b_lin"]                                            # [1, V]
    if Vp != V:
        w_lin = jnp.pad(w_lin, ((0, 0), (0, Vp - V)))
        b_lin = jnp.pad(b_lin, ((0, 0), (0, Vp - V)))

    # Time-major layout so the recurrence does cheap leading-dim loads/stores
    # (only the small E/H-wide tensors get transposed; the big [*, V] logits
    # are produced batch-first and never transposed).
    x_tbe = jnp.transpose(inputs, (1, 0, 2))                           # [T, Bp, E]

    # 1) Hoisted input projection: x @ W_ih^T + (b_ih + b_hh), fully parallel.
    gates_x = linear_pallas(
        x_tbe.reshape(T * Bp, E).astype(matmul_dtype),
        w_ih, params["lstm_bias"])                                     # [T*Bp, 4H] f32
    gates_x = gates_x.reshape(T, Bp, 4 * H)

    # 2) Sequential recurrence: only h_prev @ W_hh^T on the serial path.
    hs = decoder_lstm_hidden_pallas(gates_x, w_hh)                     # [T, Bp, H]

    # 3) Hoisted vocab projection, batch-first rows so the [B, T, V] output
    #    needs no transpose.
    h_bt = jnp.transpose(hs, (1, 0, 2)).reshape(Bp * T, H)             # [Bp*T, H]
    logits = linear_pallas(h_bt.astype(matmul_dtype), w_lin, b_lin)    # [Bp*T, Vp]
    return logits.reshape(Bp, T, Vp)[:B, :, :V]


# --------------------------------------------------------------------------
# Pure-JAX reference for validation
# --------------------------------------------------------------------------
def _reference_forward(params, features, captions):
    embed_w = params["embed_w"]
    H = params["w_hh_t"].shape[0]
    embeddings = jnp.take(embed_w, captions[:, :-1], axis=0)
    inputs = jnp.concatenate([features[:, None, :], embeddings], axis=1)
    x_tbe = jnp.transpose(inputs, (1, 0, 2)).astype(jnp.float32)
    B = x_tbe.shape[1]

    def step(carry, x_t):
        h, c = carry
        gates = x_t @ params["w_ih_t"] + h @ params["w_hh_t"] + params["lstm_bias"][0]
        i = jax.nn.sigmoid(gates[:, 0 * H:1 * H])
        f = jax.nn.sigmoid(gates[:, 1 * H:2 * H])
        g = jnp.tanh(gates[:, 2 * H:3 * H])
        o = jax.nn.sigmoid(gates[:, 3 * H:4 * H])
        c = f * c + i * g
        h = o * jnp.tanh(c)
        return (h, c), h

    h0 = jnp.zeros((B, H), jnp.float32)
    c0 = jnp.zeros((B, H), jnp.float32)
    _, hs = jax.lax.scan(step, (h0, c0), x_tbe)                        # [T, B, H]
    logits = hs @ params["w_lin_t"] + params["b_lin"][0]               # [T, B, V]
    return jnp.transpose(logits, (1, 0, 2))


# --------------------------------------------------------------------------
# Params (PyTorch-layout weights, stored transposed for the kernels)
# --------------------------------------------------------------------------
def init_params(key, embed_size, hidden_size, vocab_size):
    k = jax.random.split(key, 7)
    s = 1.0 / jnp.sqrt(hidden_size)
    w_ih = jax.random.uniform(k[0], (4 * hidden_size, embed_size), jnp.float32, -s, s)
    w_hh = jax.random.uniform(k[1], (4 * hidden_size, hidden_size), jnp.float32, -s, s)
    b_ih = jax.random.uniform(k[2], (4 * hidden_size,), jnp.float32, -s, s)
    b_hh = jax.random.uniform(k[3], (4 * hidden_size,), jnp.float32, -s, s)
    w_lin = jax.random.uniform(k[4], (vocab_size, hidden_size), jnp.float32, -s, s)
    b_lin = jax.random.uniform(k[5], (vocab_size,), jnp.float32, -s, s)
    embed_w = jax.random.normal(k[6], (vocab_size, embed_size), jnp.float32)
    return {
        "embed_w": embed_w,
        "w_ih_t": w_ih.T,                                # [E, 4H]
        "w_hh_t": w_hh.T,                                # [H, 4H]
        "lstm_bias": (b_ih + b_hh)[None, :],             # [1, 4H]
        "w_lin_t": w_lin.T,                              # [H, V]
        "b_lin": b_lin[None, :],                         # [1, V]
    }


if __name__ == "__main__":
    EMBED, HIDDEN, VOCAB = 32, 32, 128
    B, T_CAP = 2, 8                                      # captions length 8 -> seq len 8

    key = jax.random.PRNGKey(0)
    kp, kf, kc = jax.random.split(key, 3)
    params = init_params(kp, EMBED, HIDDEN, VOCAB)
    features = jax.random.normal(kf, (B, EMBED), jnp.float32)
    captions = jax.random.randint(kc, (B, T_CAP), 0, VOCAB, jnp.int32)

    ref = jax.block_until_ready(_reference_forward(params, features, captions))

    # f32 matmul path: bit-close validation.
    out_f32 = jax.block_until_ready(
        decoder_rnn_forward(params, features, captions, matmul_dtype=jnp.float32))
    assert out_f32.shape == (B, T_CAP, VOCAB)
    assert jnp.allclose(out_f32, ref, atol=1e-4, rtol=1e-4), "f32 mismatch vs reference"

    # bf16 matmul path (default perf config): loose tolerance vs the f32 reference.
    out_bf16 = jax.block_until_ready(
        decoder_rnn_forward(params, features, captions))
    assert out_bf16.shape == (B, T_CAP, VOCAB)
    assert jnp.allclose(out_bf16, ref, atol=1e-1, rtol=1e-1), "bf16 mismatch vs reference"

    print("KERNEL_OK")
</pallas_src>

<mosaic_0001>
module attributes {stable_mosaic.version = 11 : i64} {
  func.func @_linear_kernel(%arg0: i32, %arg1: i32, %arg2: memref<64x32xf32, #tpu.memory_space<vmem>>, %arg3: memref<32x128xf32, #tpu.memory_space<vmem>>, %arg4: memref<1x128xf32, #tpu.memory_space<vmem>>, %arg5: memref<64x128xf32, #tpu.memory_space<vmem>>) attributes {dimension_semantics = [#tpu.dimension_semantics<parallel>, #tpu.dimension_semantics<parallel>], iteration_bounds = array<i64: 1, 1>, scalar_prefetch = 0 : i64, scratch_operands = 0 : i64, tpu.core_type = #tpu.core_type<tc>, window_params = [{transform_indices = @transform_0, window_bounds = array<i64: 64, 32>}, {transform_indices = @transform_1, window_bounds = array<i64: 32, 128>}, {transform_indices = @transform_2, window_bounds = array<i64: 1, 128>}, {transform_indices = @transform_3, window_bounds = array<i64: 64, 128>}]} {
    %c0 = arith.constant 0 : index
    %c0_0 = arith.constant 0 : index
    %0 = vector.load %arg2[%c0, %c0_0] : memref<64x32xf32, #tpu.memory_space<vmem>>, vector<64x32xf32>
    %c0_1 = arith.constant 0 : index
    %c0_2 = arith.constant 0 : index
    %1 = vector.load %arg3[%c0_1, %c0_2] : memref<32x128xf32, #tpu.memory_space<vmem>>, vector<32x128xf32>
    %cst = arith.constant dense<0.000000e+00> : vector<64x128xf32>
    %2 = tpu.matmul %0, %1, %cst {dimension_numbers = #tpu.dot_dimension_numbers<[1], [0], [0], [1], [0, 0, 1, 1], [], []>} : vector<64x32xf32>, vector<32x128xf32>, vector<64x128xf32> -> vector<64x128xf32>
    %c0_3 = arith.constant 0 : index
    %c0_4 = arith.constant 0 : index
    %3 = vector.load %arg4[%c0_3, %c0_4] : memref<1x128xf32, #tpu.memory_space<vmem>>, vector<1x128xf32>
    %4 = vector.broadcast %3 : vector<1x128xf32> to vector<64x128xf32>
    %5 = arith.addf %2, %4 : vector<64x128xf32>
    %c0_5 = arith.constant 0 : index
    %c0_6 = arith.constant 0 : index
    %6 = vector.load %arg5[%c0_5, %c0_6] : memref<64x128xf32, #tpu.memory_space<vmem>>, vector<64x128xf32>
    tpu.vector_store %arg5[%c0_5, %c0_6], %5 {strides = array<i32>} : memref<64x128xf32, #tpu.memory_space<vmem>>, vector<64x128xf32>,
    return
  }
  func.func @transform_0(%arg0: i32, %arg1: i32) -> (i32, i32) {
    %c0_i32 = arith.constant 0 : i32
    %c0_i32_0 = arith.constant 0 : i32
    return %arg1, %c0_i32 : i32, i32
  }
  func.func @transform_1(%arg0: i32, %arg1: i32) -> (i32, i32) {
    %c0_i32 = arith.constant 0 : i32
    %c0_i32_0 = arith.constant 0 : i32
    return %c0_i32, %arg0 : i32, i32
  }
  func.func @transform_2(%arg0: i32, %arg1: i32) -> (i32, i32) {
    %c0_i32 = arith.constant 0 : i32
    %c0_i32_0 = arith.constant 0 : i32
    return %c0_i32, %arg0 : i32, i32
  }
  func.func @transform_3(%arg0: i32, %arg1: i32) -> (i32, i32) {
    %c0_i32 = arith.constant 0 : i32
    return %arg1, %arg0 : i32, i32
  }
}

</mosaic_0001>

<bundles_post_ra>
// kernel: tpu_custom_call.1
= control target key start
LH: loop header
LB: loop body
LE: loop exit
PB: predicated region body
PF: predicated region fallthrough
CT: control target
= control target key end

     0   :  { %vm34_vm0 = vcmask 261120   ;;  %s350_s0 = inlined_call_operand.vmem [shape: f32[64,32], index: 0, kind: input, shape index: {}]   ;;  %s351_s1 = inlined_call_operand.vmem [shape: f32[32,128], index: 1, kind: input, shape index: {}]   ;;  %s352_s2 = inlined_call_operand.vmem [shape: f32[1,128], index: 2, kind: input, shape index: {}]   ;;  %s353_s3 = inlined_call_operand.hbm [shape: f32[64,128], index: 3, kind: output, shape index: {}]  }
   0x1   :  { %v23_v0 = vld [vmem:[%s351_s1] sm:$0xff]  ;;  %v24_v1 = vld [vmem:[%s351_s1 + $0x8] sm:$0xff]  ;;  %v25_v2 = vld [vmem:[%s351_s1 + $0x10] sm:$0xff] }
   0x2   :  { %v229_v3 = vpack.c.bf16 %v24_v1, %v23_v0  ;;  %v26_v4 = vld [vmem:[%s351_s1 + $0x18] sm:$0xff]  ;;  %v15_v5 = vld [vmem:[%s350_s0] sm:$0xff] }
   0x3   :  { %v19_v6 = vld [vmem:[%s350_s0 + $0x20] sm:$0xff]  ;;  %v233_v7 = vpack.c.bf16 %v26_v4, %v25_v2  ;;  %217 = vmatprep.mubr.msk.f32.mxu0 %vm34_vm0, %v15_v5 }
   0x4   :  { %223 = vmatprep.mubr.msk.f32.mxu1 %vm34_vm0, %v19_v6  ;;  %230 = vmatprep.subr.bf16.mxu0 %v229_v3 }
   0x5   :  { %237 = vmatprep.subr.bf16.mxu1 %v229_v3  ;;  %232 = vmatpush3.bf16.msra.mxu0 %v229_v3 }
   0x6   :  { %239 = vmatpush3.bf16.msra.mxu1 %v229_v3 }
   0x7   :  { %8 = vsyncpa [#allocation3], 0  ;;  %234 = vmatprep.subr.bf16.mxu0 %v233_v7  ;;  %238 = vmatprep.subr.bf16.mxu1 %v233_v7  ;;  %v16_v8 = vld [vmem:[%s350_s0 + $0x8] sm:$0xff]  ;;  %v17_v10 = vld [vmem:[%s350_s0 + $0x10] sm:$0xff]  ;;  %s268_s10 = smov [#allocation2]  }
   0x8   :  { %v20_v9 = vld [vmem:[%s350_s0 + $0x28] sm:$0xff]  ;;  %v21_v11 = vld [vmem:[%s350_s0 + $0x30] sm:$0xff]  ;;  %v18_v12 = vld [vmem:[%s350_s0 + $0x18] sm:$0xff]  ;;  %s177_s11 = sshll.u32 %s268_s10, 4  ;;  %s178_s11 = int_to_ptr.vmem [resolvable:$true] %s177_s11 }
   0x9   :  { %236 = vmatpush3.bf16.msra.mxu0 %v233_v7  ;;  %v22_v13 = vld [vmem:[%s350_s0 + $0x38] sm:$0xff]  ;;  %v188_v14 = vld [vmem:[%s352_s2] ss:$0 sm:$0xff]  ;;  %s244_s0 = scalar_lea.vmem %s178_s11, 1024  ;;  %p249_p1 = scmp.lt.s32.totalorder %s178_s11, %s178_s11 }
   0xa   :  { %240 = vmatpush3.bf16.msra.mxu1 %v233_v7  ;;  %p245_p0 = scmp.ne.s32.totalorder %s178_s11, %s244_s0  ;;  %p250_p2 = scmp.lt.s32.totalorder %s244_s0, %s244_s0 }
   0xc   :  { %218 = vmatmul.mubr.msk.f32.vlgmr.msra.gmra.mrb[0].mxu0 %vm34_vm0, %v16_v8  ;;  %p251_p3 = por %p250_p2, %p249_p1 }
   0xd   :  { %224 = vmatmul.mubr.msk.f32.vlgmr.msra.gmra.mrb[0].mxu1 %vm34_vm0, %v20_v9  ;;  %220 = vmatprep.mubr.msk.f32.mxu0 %vm34_vm0, %v17_v10 }
   0xe   :  { %226 = vmatprep.mubr.msk.f32.mxu1 %vm34_vm0, %v21_v11  ;;  %p252_p4 = pnand %p251_p3, %p245_p0 }
  0x10   :  { %221 = vmatmul.mubr.msk.f32.gmra.mrb[2].mxu0 %vm34_vm0, %v18_v12 }
  0x11   :  { %227 = vmatmul.mubr.msk.f32.gmra.mrb[2].mxu1 %vm34_vm0, %v22_v13 }
  0xdf   :  { %v219_v15 = vpop.f32.mrb[0].mxu0 }
  0xe0   :  { %v225_v16 = vpop.f32.mrb[0].mxu1  ;;  %v131_v17 = vadd.f32 %v219_v15, %v188_v14  ;;  %v125_v19 = vpop.f32.mrb[1].mxu0 }
  0xe1   :  { %v151_v18 = vadd.f32 %v225_v16, %v188_v14  ;;  %v145_v20 = vpop.f32.mrb[1].mxu1  ;;  %v126_v21 = vadd.f32 %v188_v14, %v125_v19 }
  0xe2   :  { %v146_v22 = vadd.f32 %v188_v14, %v145_v20  ;;  %165 = vst [vmem:[#allocation2 + $0x8] sm:$0xff] %v131_v17 }
  0xe3   :  { %169 = vst [vmem:[#allocation2 + $0x28] sm:$0xff] %v151_v18  ;;  %164 = vst [vmem:[#allocation2] sm:$0xff] %v126_v21  ;;  %v222_v23 = vpop.f32.mrb[2].mxu0 }
  0xe4   :  { %168 = vst [vmem:[#allocation2 + $0x20] sm:$0xff] %v146_v22  ;;  %v228_v24 = vpop.f32.mrb[2].mxu1  ;;  %v141_v25 = vadd.f32 %v222_v23, %v188_v14  ;;  %v135_v27 = vpop.f32.mrb[3].mxu0 }
  0xe5   :  { %v161_v26 = vadd.f32 %v228_v24, %v188_v14  ;;  %v155_v28 = vpop.f32.mrb[3].mxu1  ;;  %v136_v29 = vadd.f32 %v188_v14, %v135_v27 }
  0xe6   :  { %v156_v30 = vadd.f32 %v188_v14, %v155_v28  ;;  %167 = vst [vmem:[#allocation2 + $0x18] sm:$0xff] %v141_v25 }
  0xe7   :  { %171 = vst [vmem:[#allocation2 + $0x38] sm:$0xff] %v161_v26  ;;  %166 = vst [vmem:[#allocation2 + $0x10] sm:$0xff] %v136_v29 }
  0xe8   :  { %170 = vst [vmem:[#allocation2 + $0x30] sm:$0xff] %v156_v30 }
  0xe9   :  { %255 = shalt.err (!%p252_p4)
}
  0xea   :  { %s256_s13 = scalar_lea.hbm %s353_s3, 1024 }
  0xeb   :  { %p257_p5 = scmp.ne.s32.totalorder %s353_s3, %s256_s13  ;;  %p260_p6 = scmp.lt.u32.totalorder %s256_s13, %s353_s3 }
  0xed   :  { %p262_p7 = pnand %p260_p6, %p257_p5 }
  0xef   :  { %265 = shalt.err (!%p262_p7)
}
  0xf0   :  { %s269_s18 = smov 128   ;;  %s270_s19 = smov 8  }
  0xf1   :  { %183 = dma.vmem_to_hbm [thread:$0]  %s178_s11, 1024, %s353_s3, [#allocation3], %s269_s18, %s269_s18, %s270_s19  }
  0xf2   :  { %266 = dma.done.wait [#allocation3], 1024  }
  0xf3   :  { %267 = vsyncadd [#allocation3], 4294966272 }
  0xf4   :  { %187 = vsyncpa [#allocation3], 1 }

</bundles_post_ra>
